<compile_context>
chip_gen: v5e
topology: v5e:2x2
jax: 0.10.0
libtpu: 0.0.40
codegen_flags: <defaults>
</compile_context>

<pallas_src>
import functools

import jax
import jax.numpy as jnp
from jax.experimental import pallas as pl
from jax.experimental.pallas import tpu as pltpu


_DEFAULT_VMEM_BUDGET = 40 << 20  # stay well under v7x's 64 MiB physical VMEM
_VMEM_SPEC = pl.BlockSpec(memory_space=pltpu.MemorySpace.VMEM)


# ---------------------------------------------------------------------------
# Kernels
# ---------------------------------------------------------------------------
def _mlp_rhs(zT, w1T, b1T, w2T, b2T):
    """tanh-MLP RHS in feature-major (batch-on-lanes) layout.

    zT: (D, B). Matmuls run at the weights' dtype on the MXU with f32
    accumulation; bias adds and tanh stay f32 (v5e VPU/EUP have no bf16 path).
    Returns f32 (D, B).
    """
    h = jnp.dot(w1T, zT.astype(w1T.dtype), preferred_element_type=jnp.float32)  # (H, B)
    h = jnp.tanh(h + b1T)                                                        # f32
    o = jnp.dot(w2T, h.astype(w2T.dtype), preferred_element_type=jnp.float32)    # (D, B)
    return o + b2T


def odefunc_kernel(zT_ref, w1T_ref, b1T_ref, w2T_ref, b2T_ref, outT_ref):
    outT_ref[...] = _mlp_rhs(zT_ref[...], w1T_ref[...], b1T_ref[...],
                             w2T_ref[...], b2T_ref[...]).astype(outT_ref.dtype)


def _euler_kernel(zT_ref, w1T_ref, b1T_ref, w2T_ref, b2T_ref, outT_ref, z_scr,
                  *, num_steps, dt):
    """num_steps Euler steps fused in one kernel; weights stay VMEM-resident."""
    z_scr[...] = zT_ref[...].astype(jnp.float32)

    def step(_, carry):
        z = z_scr[...]
        z_scr[...] = z + dt * _mlp_rhs(z, w1T_ref[...], b1T_ref[...],
                                       w2T_ref[...], b2T_ref[...])
        return carry

    jax.lax.fori_loop(0, num_steps, step, 0)
    outT_ref[...] = z_scr[...].astype(outT_ref.dtype)


# ---------------------------------------------------------------------------
# Wrappers
# ---------------------------------------------------------------------------
def _nbytes(*arrays):
    return sum(a.size * a.dtype.itemsize for a in arrays)


def _vmem_limit(nbytes):
    """Scoped-VMEM request: >= 32 MiB (covers every chip's default), enough for
    the operands with headroom, below v7x's 64 MiB physical ceiling."""
    return int(min(max(int(1.5 * nbytes) + (4 << 20), 32 << 20), 56 << 20))


def _call_whole(zT, w1T, b1T, w2T, b2T, out_dtype):
    """Gridless path: whole operands live in VMEM, no pipeline machinery."""
    D, B = zT.shape
    nbytes = _nbytes(zT, w1T, b1T, w2T, b2T) + B * D * jnp.dtype(out_dtype).itemsize
    return pl.pallas_call(
        odefunc_kernel,
        out_shape=jax.ShapeDtypeStruct((D, B), out_dtype),
        in_specs=[_VMEM_SPEC] * 5,
        out_specs=_VMEM_SPEC,
        compiler_params=pltpu.CompilerParams(vmem_limit_bytes=_vmem_limit(nbytes)),
    )(zT, w1T, b1T, w2T, b2T)


def _call_batch_tiled(zT, w1T, b1T, w2T, b2T, out_dtype, bb):
    """VMEM-gated path: tile the (lane) batch axis; weights stay resident."""
    D, B = zT.shape
    Hp = w1T.shape[0]
    tile_bytes = _nbytes(w1T, b1T, w2T, b2T) + 2 * bb * D * (
        zT.dtype.itemsize + jnp.dtype(out_dtype).itemsize)
    return pl.pallas_call(
        odefunc_kernel,
        out_shape=jax.ShapeDtypeStruct((D, B), out_dtype),
        grid=(B // bb,),
        in_specs=[
            pl.BlockSpec((D, bb), lambda i: (0, i)),    # z^T: walk batch (lane) axis
            pl.BlockSpec((Hp, D), lambda i: (0, 0)),    # weights/biases: VMEM-resident
            pl.BlockSpec((Hp, 1), lambda i: (0, 0)),
            pl.BlockSpec((D, Hp), lambda i: (0, 0)),
            pl.BlockSpec((D, 1), lambda i: (0, 0)),
        ],
        out_specs=pl.BlockSpec((D, bb), lambda i: (0, i)),
        compiler_params=pltpu.CompilerParams(
            # Batch axis is independent -> v7x megacore can shard it across TCs;
            # on single-TC v5e/v6e this path only triggers when VMEM forces it.
            dimension_semantics=("parallel",),
            vmem_limit_bytes=_vmem_limit(tile_bytes)),
    )(zT, w1T, b1T, w2T, b2T)


def _choose_batch_tile(B, D, in_item, out_item, weight_bytes, budget):
    """Largest batch tile (multiple of 128 that divides B) whose double-buffered
    z/out tiles plus the resident weights fit the VMEM budget."""
    if B % 128 != 0:
        return None
    best, bb = None, 128
    while bb <= B:
        if B % bb == 0 and weight_bytes + 2 * bb * D * (in_item + out_item) <= budget:
            best = bb
        bb *= 2
    return best


def odefunc_forward(t, z, params, *, vmem_budget_bytes=_DEFAULT_VMEM_BUDGET):
    """Pallas equivalent of ODEFunc.forward(t, z): z (B, D) -> dz/dt (B, D).
    `t` is unused, matching the PyTorch module."""
    del t
    w1T, b1T, w2T, b2T = params
    B, D = z.shape
    out_dtype = z.dtype
    zT = z.T.astype(w1T.dtype)  # (D, B): batch on the lane axis

    weight_bytes = _nbytes(w1T, b1T, w2T, b2T)
    act_bytes = _nbytes(zT) + B * D * jnp.dtype(out_dtype).itemsize
    if weight_bytes + act_bytes <= vmem_budget_bytes:
        outT = _call_whole(zT, w1T, b1T, w2T, b2T, out_dtype)
    else:
        bb = _choose_batch_tile(B, D, zT.dtype.itemsize,
                                jnp.dtype(out_dtype).itemsize,
                                weight_bytes, vmem_budget_bytes)
        if bb is None:
            # TODO(synk): batch too large for VMEM and not a multiple of 128;
            # fall back to the gridless path with a raised vmem limit.
            outT = _call_whole(zT, w1T, b1T, w2T, b2T, out_dtype)
        else:
            outT = _call_batch_tiled(zT, w1T, b1T, w2T, b2T, out_dtype, bb)
    return outT.T


def odefunc_integrate_euler(z0, params, *, num_steps, dt):
    """Fused fixed-step Euler rollout: `num_steps` RHS evaluations in ONE
    pallas_call, weights VMEM-resident throughout, state in a VMEM scratch."""
    w1T, b1T, w2T, b2T = params
    B, D = z0.shape
    zT = z0.T.astype(w1T.dtype)
    nbytes = _nbytes(zT, w1T, b1T, w2T, b2T) + 2 * B * D * 4
    kernel = functools.partial(_euler_kernel, num_steps=int(num_steps), dt=float(dt))
    outT = pl.pallas_call(
        kernel,
        out_shape=jax.ShapeDtypeStruct((D, B), z0.dtype),
        in_specs=[_VMEM_SPEC] * 5,
        out_specs=_VMEM_SPEC,
        scratch_shapes=[pltpu.VMEM((D, B), jnp.float32)],
        compiler_params=pltpu.CompilerParams(vmem_limit_bytes=_vmem_limit(nbytes)),
    )(zT, w1T, b1T, w2T, b2T)
    return outT.T


# ---------------------------------------------------------------------------
# Parameter preparation / init
# ---------------------------------------------------------------------------
def prepare_params(w1, b1, w2, b2, *, hidden_multiple=128, matmul_dtype=None):
    """Pad the hidden dim to a lane multiple and transpose into the feature-major
    layout the kernel uses. Zero padding is numerically exact (tanh(0)=0 feeds
    zero W2 rows). Only the matmul operands take `matmul_dtype` (e.g. bf16 on
    v6e/v7x); biases stay f32 so the post-dot elementwise path is f32 everywhere."""
    md = jnp.dtype(matmul_dtype) if matmul_dtype is not None else jnp.dtype(w1.dtype)
    H = w1.shape[1]
    Hp = ((H + hidden_multiple - 1) // hidden_multiple) * hidden_multiple
    pad = Hp - H
    w1p = jnp.pad(w1, ((0, 0), (0, pad)))
    b1p = jnp.pad(b1.reshape(1, -1), ((0, 0), (0, pad)))
    w2p = jnp.pad(w2, ((0, pad), (0, 0)))
    return (w1p.T.astype(md),                         # (Hp, D)
            b1p.T.astype(jnp.float32),                # (Hp, 1)
            w2p.T.astype(md),                         # (D, Hp)
            b2.reshape(1, -1).T.astype(jnp.float32))  # (D, 1)


def init_params(key, latent_dim, hidden=50, dtype=jnp.float32):
    """Mimics nn.Linear default init: U(-1/sqrt(fan_in), +1/sqrt(fan_in))."""
    k1, k2, k3, k4 = jax.random.split(key, 4)
    bound1 = 1.0 / jnp.sqrt(latent_dim)
    bound2 = 1.0 / jnp.sqrt(hidden)
    w1 = jax.random.uniform(k1, (latent_dim, hidden), dtype, -bound1, bound1)
    b1 = jax.random.uniform(k2, (1, hidden), dtype, -bound1, bound1)
    w2 = jax.random.uniform(k3, (hidden, latent_dim), dtype, -bound2, bound2)
    b2 = jax.random.uniform(k4, (1, latent_dim), dtype, -bound2, bound2)
    return w1, b1, w2, b2


if __name__ == "__main__":
    latent_dim = 32
    hidden = 50

    key = jax.random.PRNGKey(0)
    kz1, kz2, kz3, kp = jax.random.split(key, 4)
    w1, b1, w2, b2 = init_params(kp, latent_dim, hidden)
    params = prepare_params(w1, b1, w2, b2)

    HIGH = jax.lax.Precision.HIGHEST

    def ref_forward(z):
        h = jnp.tanh(jnp.dot(z, w1, precision=HIGH) + b1)
        return jnp.dot(h, w2, precision=HIGH) + b2

    t = jnp.float32(0.0)  # unused, as in the PyTorch module

    # 1) Small batch -> gridless whole-VMEM path.
    z_small = jax.random.normal(kz1, (8, latent_dim), jnp.float32)
    out_small = jax.block_until_ready(odefunc_forward(t, z_small, params))
    assert out_small.shape == (8, latent_dim)
    assert jnp.allclose(out_small, ref_forward(z_small), atol=1e-4, rtol=1e-4)

    # 2) Bigger batch, still gridless (operands are ~KiB, far below the budget).
    z_big = jax.random.normal(kz2, (256, latent_dim), jnp.float32)
    out_big = jax.block_until_ready(odefunc_forward(t, z_big, params))
    assert out_big.shape == (256, latent_dim)
    assert jnp.allclose(out_big, ref_forward(z_big), atol=1e-4, rtol=1e-4)

    # 3) Force the VMEM-gated, batch-tiled grid path with a tiny budget.
    z_tiled = jax.random.normal(kz3, (512, latent_dim), jnp.float32)
    out_tiled = jax.block_until_ready(
        odefunc_forward(t, z_tiled, params, vmem_budget_bytes=128 << 10))
    assert jnp.allclose(out_tiled, ref_forward(z_tiled), atol=1e-4, rtol=1e-4)

    # 4) bf16 matmul inputs (HBM/MXU win on v6e/v7x); f32 accumulate keeps error small.
    params_bf16 = prepare_params(w1, b1, w2, b2, matmul_dtype=jnp.bfloat16)
    out_bf16 = jax.block_until_ready(odefunc_forward(t, z_big, params_bf16))
    assert out_bf16.dtype == jnp.float32
    assert jnp.allclose(out_bf16, ref_forward(z_big), atol=3e-2, rtol=3e-2)

    # 5) Fused Euler integrator: 8 RHS evaluations in a single pallas_call.
    num_steps, dt = 8, 0.1
    out_euler = jax.block_until_ready(
        odefunc_integrate_euler(z_big, params, num_steps=num_steps, dt=dt))
    z_ref = z_big
    for _ in range(num_steps):
        z_ref = z_ref + dt * ref_forward(z_ref)
    assert jnp.allclose(out_euler, z_ref, atol=1e-3, rtol=1e-3)

    print("KERNEL_OK")
</pallas_src>

<mosaic_0001>
module attributes {stable_mosaic.version = 11 : i64} {
  func.func @odefunc_kernel(%arg0: memref<32x8xf32, #tpu.memory_space<vmem>>, %arg1: memref<128x32xf32, #tpu.memory_space<vmem>>, %arg2: memref<128x1xf32, #tpu.memory_space<vmem>>, %arg3: memref<32x128xf32, #tpu.memory_space<vmem>>, %arg4: memref<32x1xf32, #tpu.memory_space<vmem>>, %arg5: memref<32x8xf32, #tpu.memory_space<vmem>>) attributes {dimension_semantics = [], scalar_prefetch = 0 : i64, scratch_operands = 0 : i64, tpu.core_type = #tpu.core_type<tc>} {
    %c0 = arith.constant 0 : index
    %c0_0 = arith.constant 0 : index
    %0 = vector.load %arg0[%c0, %c0_0] : memref<32x8xf32, #tpu.memory_space<vmem>>, vector<32x8xf32>
    %c0_1 = arith.constant 0 : index
    %c0_2 = arith.constant 0 : index
    %1 = vector.load %arg1[%c0_1, %c0_2] : memref<128x32xf32, #tpu.memory_space<vmem>>, vector<128x32xf32>
    %c0_3 = arith.constant 0 : index
    %c0_4 = arith.constant 0 : index
    %2 = vector.load %arg2[%c0_3, %c0_4] : memref<128x1xf32, #tpu.memory_space<vmem>>, vector<128x1xf32>
    %c0_5 = arith.constant 0 : index
    %c0_6 = arith.constant 0 : index
    %3 = vector.load %arg3[%c0_5, %c0_6] : memref<32x128xf32, #tpu.memory_space<vmem>>, vector<32x128xf32>
    %c0_7 = arith.constant 0 : index
    %c0_8 = arith.constant 0 : index
    %4 = vector.load %arg4[%c0_7, %c0_8] : memref<32x1xf32, #tpu.memory_space<vmem>>, vector<32x1xf32>
    %cst = arith.constant dense<0.000000e+00> : vector<128x8xf32>
    %5 = tpu.matmul %1, %0, %cst {dimension_numbers = #tpu.dot_dimension_numbers<[1], [0], [0], [1], [0, 0, 1, 1], [], []>} : vector<128x32xf32>, vector<32x8xf32>, vector<128x8xf32> -> vector<128x8xf32>
    %6 = vector.broadcast %2 : vector<128x1xf32> to vector<128x8xf32>
    %7 = arith.addf %5, %6 : vector<128x8xf32>
    %8 = math.tanh %7 : vector<128x8xf32>
    %cst_9 = arith.constant dense<0.000000e+00> : vector<32x8xf32>
    %9 = tpu.matmul %3, %8, %cst_9 {dimension_numbers = #tpu.dot_dimension_numbers<[1], [0], [0], [1], [0, 0, 1, 1], [], []>} : vector<32x128xf32>, vector<128x8xf32>, vector<32x8xf32> -> vector<32x8xf32>
    %10 = vector.broadcast %4 : vector<32x1xf32> to vector<32x8xf32>
    %11 = arith.addf %9, %10 : vector<32x8xf32>
    %c0_10 = arith.constant 0 : index
    %c0_11 = arith.constant 0 : index
    %12 = vector.load %arg5[%c0_10, %c0_11] : memref<32x8xf32, #tpu.memory_space<vmem>>, vector<32x8xf32>
    tpu.vector_store %arg5[%c0_10, %c0_11], %11 {strides = array<i32>} : memref<32x8xf32, #tpu.memory_space<vmem>>, vector<32x8xf32>,
    return
  }
}

</mosaic_0001>

<bundles_post_ra>
// kernel: tpu_custom_call.1
= control target key start
LH: loop header
LB: loop body
LE: loop exit
PB: predicated region body
PF: predicated region fallthrough
CT: control target
= control target key end

     0   :  { %v408_v0 = vmov 0   ;;  %vm144_vm0 = vcmask 261120   ;;  %vm323_vm1 = vcmask 64512   ;;  %s608_s2 = inlined_call_operand.vmem [shape: f32[128,1], index: 2, kind: input, shape index: {}]   ;;  %s609_s0 = inlined_call_operand.vmem [shape: f32[32,8], index: 0, kind: input, shape index: {}]   ;;  %s610_s1 = inlined_call_operand.vmem [shape: f32[128,32], index: 1, kind: input, shape index: {}]   ;;  %s611_s4 = inlined_call_operand.vmem [shape: f32[32,1], index: 4, kind: input, shape index: {}]   ;;  %s612_s3 = inlined_call_operand.vmem [shape: f32[32,128], index: 3, kind: input, shape index: {}]   ;;  %s613_s5 = inlined_call_operand.vmem [shape: f32[32,8], index: 5, kind: output, shape index: {}]  }
   0x1   :  { %373 = vset.pattern.permute.xlu0 %v408_v0  ;;  %v55_v1 = vld [vmem:[%s608_s2 + $0x78] sm:$0xff]  ;;  %374 = vset.pattern.permute.xlu1 %v408_v0  ;;  %v53_v3 = vld [vmem:[%s608_s2 + $0x68] sm:$0xff]  ;;  %v22_v4 = vld [vmem:[%s609_s0 + $0x10] sm:$0xff] }
   0x2   :  { %v23_v2 = vld [vmem:[%s609_s0 + $0x18] sm:$0xff]  ;;  %141 = vperm.xlu0 %373, %v55_v1   ;;  %v21_v5 = vld [vmem:[%s609_s0 + $0x8] sm:$0xff]  ;;  %131 = vperm.xlu1 %374, %v53_v3   ;;  %v20_v6 = vld [vmem:[%s609_s0] sm:$0xff] }
   0x3   :  { %205 = vmatpush.msra.mxu0 %v23_v2  ;;  %348 = vmatpush.msra.mxu2 %v23_v2  ;;  %v24_v7 = vld [vmem:[%s610_s1] sm:$0xff]  ;;  %v30_v8 = vld [vmem:[%s610_s1 + $0x30] sm:$0xff]  ;;  %v51_v12 = vld [vmem:[%s608_s2 + $0x58] sm:$0xff] }
   0x4   :  { %349 = vmatpush.msra.mxu3 %v23_v2  ;;  %375 = vset.pattern.permute.xlu2 %v408_v0  ;;  %v36_v9 = vld [vmem:[%s610_s1 + $0x60] sm:$0xff]  ;;  %v54_v10 = vld [vmem:[%s608_s2 + $0x70] sm:$0xff]  ;;  %v25_v13 = vld [vmem:[%s610_s1 + $0x8] sm:$0xff] }
   0x5   :  { %206 = vmatpush.msra.mxu0 %v22_v4  ;;  %350 = vmatpush.msra.mxu2 %v22_v4  ;;  %v52_v11 = vld [vmem:[%s608_s2 + $0x60] sm:$0xff]  ;;  %v31_v14 = vld [vmem:[%s610_s1 + $0x38] sm:$0xff]  ;;  %v37_v15 = vld [vmem:[%s610_s1 + $0x68] sm:$0xff] }
   0x6   :  { %351 = vmatpush.msra.mxu3 %v22_v4  ;;  %121 = vperm.xlu2 %375, %v51_v12   ;;  %v49_v16 = vld [vmem:[%s608_s2 + $0x48] sm:$0xff]  ;;  %v48_v17 = vld [vmem:[%s608_s2 + $0x40] sm:$0xff]  ;;  %v50_v18 = vld [vmem:[%s608_s2 + $0x50] sm:$0xff] }
   0x7   :  { %207 = vmatpush.msra.mxu0 %v21_v5  ;;  %352 = vmatpush.msra.mxu2 %v21_v5  ;;  %v26_v19 = vld [vmem:[%s610_s1 + $0x10] sm:$0xff]  ;;  %v32_v20 = vld [vmem:[%s610_s1 + $0x40] sm:$0xff]  ;;  %v45_v23 = vld [vmem:[%s608_s2 + $0x28] sm:$0xff] }
   0x8   :  { %353 = vmatpush.msra.mxu3 %v21_v5  ;;  %v38_v21 = vld [vmem:[%s610_s1 + $0x70] sm:$0xff]  ;;  %v47_v24 = vld [vmem:[%s608_s2 + $0x38] sm:$0xff]  ;;  %v33_v26 = vld [vmem:[%s610_s1 + $0x48] sm:$0xff] }
   0x9   :  { %208 = vmatpush.msra.mxu0 %v20_v6  ;;  %354 = vmatpush.msra.mxu2 %v20_v6  ;;  %v46_v22 = vld [vmem:[%s608_s2 + $0x30] sm:$0xff]  ;;  %v27_v25 = vld [vmem:[%s610_s1 + $0x18] sm:$0xff]  ;;  %v44_v30 = vld [vmem:[%s608_s2 + $0x20] sm:$0xff] }
   0xa   :  { %355 = vmatpush.msra.mxu3 %v20_v6  ;;  %332 = vmatmul.msk.f32.vlgmr.msra.gmra.mxu0 %vm144_vm0, %v24_v7  ;;  %v39_v27 = vld [vmem:[%s610_s1 + $0x78] sm:$0xff]  ;;  %v42_v29 = vld [vmem:[%s608_s2 + $0x10] sm:$0xff]  ;;  %v28_v31 = vld [vmem:[%s610_s1 + $0x20] sm:$0xff] }
   0xb   :  { %338 = vmatmul.msk.f32.vlgmr.msra.gmra.mxu2 %vm144_vm0, %v30_v8  ;;  %344 = vmatmul.msk.f32.vlgmr.msra.gmra.mxu3 %vm144_vm0, %v36_v9  ;;  %v43_v28 = vld [vmem:[%s608_s2 + $0x18] sm:$0xff]  ;;  %v34_v32 = vld [vmem:[%s610_s1 + $0x50] sm:$0xff]  ;;  %v40_v33 = vld [vmem:[%s608_s2] sm:$0xff] }
   0xc   :  { %136 = vperm.xlu0 %373, %v54_v10   ;;  %126 = vperm.xlu1 %374, %v52_v11   ;;  %v60_v34 = vld [vmem:[%s611_s4] sm:$0xff]  ;;  %v41_v35 = vld [vmem:[%s608_s2 + $0x8] sm:$0xff]  ;;  %v35_v37 = vld [vmem:[%s610_s1 + $0x58] sm:$0xff] }
   0xd   :  { %v29_v36 = vld [vmem:[%s610_s1 + $0x28] sm:$0xff]  ;;  %v62_v38 = vld [vmem:[%s611_s4 + $0x10] sm:$0xff]  ;;  %v63_v39 = vld [vmem:[%s611_s4 + $0x18] sm:$0xff] }
   0xe   :  { %116 = vperm.xlu2 %375, %v50_v18   ;;  %v61_v40 = vld [vmem:[%s611_s4 + $0x8] sm:$0xff] }
  0x12   :  { %333 = vmatmul.msk.f32.gmra.mxu0 %vm144_vm0, %v25_v13 }
  0x13   :  { %339 = vmatmul.msk.f32.gmra.mxu2 %vm144_vm0, %v31_v14  ;;  %345 = vmatmul.msk.f32.gmra.mxu3 %vm144_vm0, %v37_v15 }
  0x14   :  { %111 = vperm.xlu0 %373, %v49_v16   ;;  %106 = vperm.xlu1 %374, %v48_v17  }
  0x16   :  { %101 = vperm.xlu2 %375, %v47_v24  }
  0x1a   :  { %334 = vmatmul.msk.f32.gmra.mxu0 %vm144_vm0, %v26_v19 }
  0x1b   :  { %340 = vmatmul.msk.f32.gmra.mxu2 %vm144_vm0, %v32_v20  ;;  %346 = vmatmul.msk.f32.gmra.mxu3 %vm144_vm0, %v38_v21 }
  0x1c   :  { %96 = vperm.xlu0 %373, %v46_v22   ;;  %91 = vperm.xlu1 %374, %v45_v23  }
  0x1e   :  { %86 = vperm.xlu2 %375, %v44_v30  }
  0x22   :  { %335 = vmatmul.msk.f32.gmra.mxu0 %vm144_vm0, %v27_v25 }
  0x23   :  { %341 = vmatmul.msk.f32.gmra.mxu2 %vm144_vm0, %v33_v26  ;;  %347 = vmatmul.msk.f32.gmra.mxu3 %vm144_vm0, %v39_v27 }
  0x24   :  { %81 = vperm.xlu0 %373, %v43_v28   ;;  %76 = vperm.xlu1 %374, %v42_v29  }
  0x26   :  { %71 = vperm.xlu2 %375, %v41_v35  }
  0x2a   :  { %336 = vmatmul.msk.f32.gmra.mxu0 %vm144_vm0, %v28_v31 }
  0x2b   :  { %342 = vmatmul.msk.f32.gmra.mxu2 %vm144_vm0, %v34_v32 }
  0x2c   :  { %66 = vperm.xlu0 %373, %v40_v33   ;;  %276 = vperm.xlu1 %374, %v60_v34  }
  0x2e   :  { %281 = vperm.xlu2 %375, %v61_v40   ;;  %v56_v40 = vld [vmem:[%s612_s3] sm:$0xff] }
  0x32   :  { %337 = vmatmul.msk.f32.gmra.mxu0 %vm144_vm0, %v29_v36 }
  0x33   :  { %343 = vmatmul.msk.f32.gmra.mxu2 %vm144_vm0, %v35_v37 }
  0x34   :  { %286 = vperm.xlu0 %373, %v62_v38   ;;  %291 = vperm.xlu1 %374, %v63_v39  }
  0x60   :  { %v122_v48 = vpop.permute.xlu2 %121 }
  0x68   :  { %v117_v57 = vpop.permute.xlu2 %116 }
  0x70   :  { %v102_v4 = vpop.permute.xlu2 %101 }
  0x74   :  { %v142_v44 = vpop.permute.xlu0 %141  ;;  %v132_v49 = vpop.permute.xlu1 %131 }
  0x78   :  { %v87_v15 = vpop.permute.xlu2 %86 }
  0x7e   :  { %v137_v52 = vpop.permute.xlu0 %136  ;;  %v127_v56 = vpop.permute.xlu1 %126 }
  0x80   :  { %v72_v28 = vpop.permute.xlu2 %71 }
  0x86   :  { %v112_v60 = vpop.permute.xlu0 %111  ;;  %v107_v3 = vpop.permute.xlu1 %106 }
  0x87   :  { %v575_v41 = vpop.f32.mrf.mxu0 }
  0x8e   :  { %v228_v42 = vpop.f32.mrf.mxu2  ;;  %v246_v43 = vpop.f32.mrf.mxu3 }
  0x8f   :  { %v577_v45 = vpop.f32.mrf.mxu0  ;;  %v247_v63 = vadd.f32 %v246_v43, %v127_v56  ;;  %v97_v6 = vpop.permute.xlu0 %96  ;;  %v57_v43 = vld [vmem:[%s612_s3 + $0x8] sm:$0xff] }
  0x90   :  { %v92_v14 = vpop.permute.xlu1 %91  ;;  %v229_v20 = vadd.f32 %v228_v42, %v97_v6  ;;  %v214_v33 = vadd.f32 %v577_v45, %v72_v28 }
  0x96   :  { %v231_v46 = vpop.f32.mrf.mxu2  ;;  %v249_v47 = vpop.f32.mrf.mxu3 }
  0x97   :  { %v579_v53 = vpop.f32.mrf.mxu0  ;;  %v250_v61 = vadd.f32 %v249_v47, %v132_v49  ;;  %v232_v16 = vadd.f32 %v231_v46, %v102_v4  ;;  %v82_v17 = vpop.permute.xlu0 %81 }
  0x98   :  { %v77_v27 = vpop.permute.xlu1 %76 }
  0x99   :  { %v217_v30 = vadd.f32 %v579_v53, %v77_v27 }
  0x9e   :  { %v234_v50 = vpop.f32.mrf.mxu2  ;;  %v252_v51 = vpop.f32.mrf.mxu3 }
  0x9f   :  { %v253_v58 = vadd.f32 %v252_v51, %v137_v52  ;;  %v219_v62 = vpop.f32.mrf.mxu0  ;;  %v235_v13 = vadd.f32 %v234_v50, %v107_v3  ;;  %v67_v31 = vpop.permute.xlu0 %66 }
  0xa0   :  { %v220_v26 = vadd.f32 %v219_v62, %v82_v17  ;;  %v211_v35 = vadd.f32 %v575_v41, %v67_v31  ;;  %v59_v41 = vld [vmem:[%s612_s3 + $0x18] sm:$0xff]  ;;  %v277_v45 = vpop.permute.xlu1 %276  ;;  %v282_v51 = vpop.permute.xlu2 %281 }
  0xa6   :  { %v237_v54 = vpop.f32.mrf.mxu2  ;;  %v255_v55 = vpop.f32.mrf.mxu3 }
  0xa7   :  { %v256_v59 = vadd.f32 %v255_v55, %v142_v44  ;;  %v222_v7 = vpop.f32.mrf.mxu0  ;;  %v238_v12 = vadd.f32 %v237_v54, %v112_v60  ;;  %v58_v44 = vld [vmem:[%s612_s3 + $0x10] sm:$0xff]  ;;  %v287_v54 = vpop.permute.xlu0 %286 }
  0xa8   :  { %v223_v24 = vadd.f32 %v222_v7, %v87_v15 }
  0xa9   :  { %376 = vtanh.f32 %v256_v59 }
  0xaa   :  { %378 = vtanh.f32 %v253_v58 }
  0xab   :  { %380 = vtanh.f32 %v250_v61 }
  0xac   :  { %382 = vtanh.f32 %v247_v63 }
  0xae   :  { %v240_v0 = vpop.f32.mrf.mxu2 }
  0xaf   :  { %v377_v1 = vpop.eup %376  ;;  %v241_v10 = vadd.f32 %v240_v0, %v117_v57  ;;  %v225_v18 = vpop.f32.mrf.mxu0 }
  0xb0   :  { %294 = vmatpush.msra.mxu1 %v377_v1  ;;  %356 = vmatpush.msrb.mxu3 %v377_v1  ;;  %v379_v2 = vpop.eup %378  ;;  %v226_v22 = vadd.f32 %v225_v18, %v92_v14 }
  0xb1   :  { %v381_v5 = vpop.eup %380 }
  0xb2   :  { %295 = vmatpush.msra.mxu1 %v379_v2  ;;  %357 = vmatpush.msrb.mxu3 %v379_v2  ;;  %v383_v8 = vpop.eup %382 }
  0xb4   :  { %296 = vmatpush.msra.mxu1 %v381_v5  ;;  %358 = vmatpush.msrb.mxu3 %v381_v5 }
  0xb6   :  { %v243_v9 = vpop.f32.mrf.mxu2  ;;  %297 = vmatpush.msra.mxu1 %v383_v8  ;;  %359 = vmatpush.msrb.mxu3 %v383_v8 }
  0xb7   :  { %v244_v11 = vadd.f32 %v243_v9, %v122_v48  ;;  %v292_v48 = vpop.permute.xlu1 %291 }
  0xb9   :  { %384 = vtanh.f32 %v244_v11 }
  0xba   :  { %386 = vtanh.f32 %v241_v10 }
  0xbb   :  { %388 = vtanh.f32 %v238_v12 }
  0xbc   :  { %390 = vtanh.f32 %v235_v13 }
  0xbd   :  { %392 = vtanh.f32 %v232_v16 }
  0xbe   :  { %394 = vtanh.f32 %v229_v20 }
  0xbf   :  { %v385_v19 = vpop.eup %384  ;;  %396 = vtanh.f32 %v226_v22 }
  0xc0   :  { %298 = vmatpush.msra.mxu1 %v385_v19  ;;  %360 = vmatpush.msrb.mxu3 %v385_v19  ;;  %v387_v21 = vpop.eup %386  ;;  %398 = vtanh.f32 %v223_v24 }
  0xc1   :  { %v389_v23 = vpop.eup %388  ;;  %400 = vtanh.f32 %v220_v26 }
  0xc2   :  { %299 = vmatpush.msra.mxu1 %v387_v21  ;;  %361 = vmatpush.msrb.mxu3 %v387_v21  ;;  %v391_v25 = vpop.eup %390  ;;  %402 = vtanh.f32 %v217_v30 }
  0xc3   :  { %v393_v29 = vpop.eup %392  ;;  %404 = vtanh.f32 %v214_v33 }
  0xc4   :  { %300 = vmatpush.msra.mxu1 %v389_v23  ;;  %362 = vmatpush.msrb.mxu3 %v389_v23  ;;  %v395_v32 = vpop.eup %394  ;;  %406 = vtanh.f32 %v211_v35 }
  0xc5   :  { %v397_v34 = vpop.eup %396 }
  0xc6   :  { %301 = vmatpush.msra.mxu1 %v391_v25  ;;  %363 = vmatpush.msrb.mxu3 %v391_v25  ;;  %v399_v36 = vpop.eup %398 }
  0xc7   :  { %v401_v37 = vpop.eup %400 }
  0xc8   :  { %302 = vmatpush.msra.mxu1 %v393_v29  ;;  %364 = vmatpush.msrb.mxu3 %v393_v29  ;;  %v403_v38 = vpop.eup %402 }
  0xc9   :  { %v405_v39 = vpop.eup %404 }
  0xca   :  { %303 = vmatpush.msra.mxu1 %v395_v32  ;;  %365 = vmatpush.msrb.mxu3 %v395_v32  ;;  %v407_v42 = vpop.eup %406 }
  0xcc   :  { %304 = vmatpush.msra.mxu1 %v397_v34  ;;  %366 = vmatpush.msrb.mxu3 %v397_v34 }
  0xce   :  { %305 = vmatpush.msra.mxu1 %v399_v36  ;;  %367 = vmatpush.msrb.mxu3 %v399_v36 }
  0xd0   :  { %306 = vmatpush.msra.mxu1 %v401_v37  ;;  %368 = vmatpush.msrb.mxu3 %v401_v37 }
  0xd2   :  { %307 = vmatpush.msra.mxu1 %v403_v38  ;;  %369 = vmatpush.msrb.mxu3 %v403_v38 }
  0xd4   :  { %308 = vmatpush.msra.mxu1 %v405_v39  ;;  %370 = vmatpush.msrb.mxu3 %v405_v39 }
  0xd6   :  { %309 = vmatpush.msra.mxu1 %v407_v42  ;;  %371 = vmatpush.msrb.mxu3 %v407_v42 }
  0xd7   :  { %310 = vmatmul.f32.vlgmr.msra.gmra.mxu1 %v56_v40  ;;  %319 = vmatmul.f32.vlgmr.msrb.gmra.mxu3 %v59_v41 }
  0xdf   :  { %313 = vmatmul.f32.gmra.mxu1 %v57_v43 }
  0xe7   :  { %316 = vmatmul.f32.gmra.mxu1 %v58_v44 }
 0x154   :  { %v311_v46 = vpop.f32.mrf.mxu1 }
 0x155   :  { %v312_v47 = vadd.f32 %v311_v46, %v277_v45 }
 0x157   :  { %324 = vst.msk [vmem:[%s613_s5] sm:$0xff] %vm323_vm1, %v312_v47 }
 0x15a   :  { %v320_v49 = vpop.f32.mrf.mxu3 }
 0x15b   :  { %v321_v50 = vadd.f32 %v320_v49, %v292_v48 }
 0x15c   :  { %v314_v52 = vpop.f32.mrf.mxu1 }
 0x15d   :  { %327 = vst.msk [vmem:[%s613_s5 + $0x18] sm:$0xff] %vm323_vm1, %v321_v50  ;;  %v315_v53 = vadd.f32 %v314_v52, %v282_v51 }
 0x15f   :  { %325 = vst.msk [vmem:[%s613_s5 + $0x8] sm:$0xff] %vm323_vm1, %v315_v53 }
 0x164   :  { %v317_v55 = vpop.f32.mrf.mxu1 }
 0x165   :  { %v318_v56 = vadd.f32 %v317_v55, %v287_v54 }
 0x167   :  { %326 = vst.msk [vmem:[%s613_s5 + $0x10] sm:$0xff] %vm323_vm1, %v318_v56 }

</bundles_post_ra>
